<compile_context>
chip_gen: v5e
topology: v5e:2x2
jax: 0.10.0
libtpu: 0.0.40
codegen_flags: <defaults>
</compile_context>

<pallas_src>
import functools

import jax
import jax.numpy as jnp
from jax import lax
from jax.experimental import pallas as pl
from jax.experimental.pallas import tpu as pltpu

NEG_SLOPE = 0.01            # nn.LeakyReLU() default negative_slope
BN_EPS = 1e-5               # nn.BatchNorm1d default eps
CONV_COMPUTE_DTYPE = jnp.float32   # set jnp.bfloat16 on v6e/v7x for lower HBM/VMEM use


def _conv_same_1d(h, w_flat, ksize, dil):
    """'same' dilated 1-D conv of h:(C, L) as one MXU matmul.

    w_flat is (Cout, ksize*C) with rows laid out tap-major: w_flat[o, t*C + c] = w[o, c, t].
    Odd ksize assumed (module default 3), so 'same' padding is symmetric.
    """
    c, length = h.shape
    pad = dil * ((ksize - 1) // 2)
    z = jnp.zeros((c, pad), h.dtype)
    hp = jnp.concatenate([z, h, z], axis=1)                       # (C, L + 2*pad)
    # im2col: stack the K shifted views along the sublane (contraction) axis.
    stacked = jnp.concatenate(
        [hp[:, t * dil: t * dil + length] for t in range(ksize)], axis=0)   # (C*K, L)
    return jnp.dot(w_flat, stacked, preferred_element_type=jnp.float32)     # (Cout, L) f32


def _conv_stats_kernel(x_ref, w_ref, y_ref, sum_ref, ssq_ref, *, ksize, dil):
    """Pass 1: y = conv1(x); emit per-batch partial BN statistics of y."""
    x = x_ref[0].astype(CONV_COMPUTE_DTYPE)                       # (Cin, L)
    y = _conv_same_1d(x, w_ref[...].astype(CONV_COMPUTE_DTYPE), ksize, dil)
    y_ref[0] = y.astype(y_ref.dtype)
    sum_ref[0] = jnp.sum(y, axis=1, keepdims=True)                # (Cmid, 1)
    ssq_ref[0] = jnp.sum(y * y, axis=1, keepdims=True)


def _bn_act_conv_stats_kernel(y1_ref, s_ref, b_ref, w_ref,
                              y2_ref, sum_ref, ssq_ref, *, ksize, dil):
    """Pass 2: h = LeakyReLU(y1*scale1 + bias1); y2 = conv2(h); partial stats of y2."""
    h = y1_ref[0].astype(jnp.float32) * s_ref[...] + b_ref[...]   # fused BN affine
    h = jnp.maximum(h, NEG_SLOPE * h)                             # LeakyReLU
    y = _conv_same_1d(h.astype(CONV_COMPUTE_DTYPE),
                      w_ref[...].astype(CONV_COMPUTE_DTYPE), ksize, dil)
    y2_ref[0] = y.astype(y2_ref.dtype)
    sum_ref[0] = jnp.sum(y, axis=1, keepdims=True)
    ssq_ref[0] = jnp.sum(y * y, axis=1, keepdims=True)


def _bn_act_kernel(y_ref, s_ref, b_ref, o_ref):
    """Pass 3: out = LeakyReLU(y2*scale2 + bias2)."""
    y = y_ref[0].astype(jnp.float32) * s_ref[...] + b_ref[...]
    o_ref[0] = jnp.maximum(y, NEG_SLOPE * y).astype(o_ref.dtype)


def _finalize_bn(sum_nc1, ssq_nc1, gamma, beta, count):
    """Tiny per-channel reduction: fold batch stats into a single (scale, bias) pair."""
    mean = jnp.sum(sum_nc1, axis=0) / count                       # (C, 1)
    var = jnp.maximum(jnp.sum(ssq_nc1, axis=0) / count - mean * mean, 0.0)  # biased var, f32
    scale = gamma.reshape(-1, 1).astype(jnp.float32) * lax.rsqrt(var + BN_EPS)
    bias = beta.reshape(-1, 1).astype(jnp.float32) - mean * scale
    return scale, bias


def _cparams(*block_nbytes):
    """Megacore-parallel grid + scoped-VMEM limit derived from the block working set."""
    need = 2 * sum(block_nbytes) + 4 * max(block_nbytes) + (2 << 20)  # dbl-buffer + im2col
    return pltpu.CompilerParams(
        dimension_semantics=("parallel",),
        vmem_limit_bytes=int(min(max(need, 8 << 20), 64 << 20)),      # fits v7x's 64 MiB
    )


def double_conv(x, w1, g1, b1, w2, g2, b2, *, dilation=1, dilation_scale=2):
    """x: (N, Cin, L); w1: (Cmid, Cin, K); w2: (Cout, Cmid, K); g*/b*: per-channel."""
    n, cin, length = x.shape
    cmid, _, k = w1.shape
    cout = w2.shape[0]
    count = jnp.float32(n * length)
    f32 = jnp.float32

    # (Cout, Cin, K) -> (Cout, K*Cin): row layout matches the tap-major im2col stack.
    w1f = jnp.transpose(w1, (0, 2, 1)).reshape(cmid, k * cin).astype(f32)
    w2f = jnp.transpose(w2, (0, 2, 1)).reshape(cout, k * cmid).astype(f32)
    xf = x.astype(f32)

    # NOTE: grid over batch; for extremely long sequences an inner L-tile grid axis with
    # halo loads would bound VMEM further (not needed at ECG-scale L).
    row_spec = lambda c: pl.BlockSpec((1, c, length), lambda i: (i, 0, 0))
    stat_spec = lambda c: pl.BlockSpec((1, c, 1), lambda i: (i, 0, 0))
    full_spec = lambda a: pl.BlockSpec(a.shape, lambda i: (0,) * a.ndim)

    xbytes, y1bytes, y2bytes = 4 * cin * length, 4 * cmid * length, 4 * cout * length

    # ---- pass 1: conv1 + per-batch partial BN stats --------------------------------
    y1, s1, q1 = pl.pallas_call(
        functools.partial(_conv_stats_kernel, ksize=k, dil=dilation),
        grid_spec=pltpu.PrefetchScalarGridSpec(
            num_scalar_prefetch=0, grid=(n,),
            in_specs=[row_spec(cin), full_spec(w1f)],
            out_specs=[row_spec(cmid), stat_spec(cmid), stat_spec(cmid)]),
        out_shape=[jax.ShapeDtypeStruct((n, cmid, length), f32),
                   jax.ShapeDtypeStruct((n, cmid, 1), f32),
                   jax.ShapeDtypeStruct((n, cmid, 1), f32)],
        compiler_params=_cparams(xbytes, y1bytes),
    )(xf, w1f)
    scale1, bias1 = _finalize_bn(s1, q1, g1, b1, count)

    # ---- pass 2: BN1 affine + LeakyReLU -> conv2 + partial BN stats -----------------
    y2, s2, q2 = pl.pallas_call(
        functools.partial(_bn_act_conv_stats_kernel, ksize=k,
                          dil=dilation * dilation_scale),
        grid_spec=pltpu.PrefetchScalarGridSpec(
            num_scalar_prefetch=0, grid=(n,),
            in_specs=[row_spec(cmid), full_spec(scale1), full_spec(bias1), full_spec(w2f)],
            out_specs=[row_spec(cout), stat_spec(cout), stat_spec(cout)]),
        out_shape=[jax.ShapeDtypeStruct((n, cout, length), f32),
                   jax.ShapeDtypeStruct((n, cout, 1), f32),
                   jax.ShapeDtypeStruct((n, cout, 1), f32)],
        compiler_params=_cparams(y1bytes, y2bytes),
    )(y1, scale1, bias1, w2f)
    scale2, bias2 = _finalize_bn(s2, q2, g2, b2, count)

    # ---- pass 3: BN2 affine + LeakyReLU ---------------------------------------------
    out = pl.pallas_call(
        _bn_act_kernel,
        grid_spec=pltpu.PrefetchScalarGridSpec(
            num_scalar_prefetch=0, grid=(n,),
            in_specs=[row_spec(cout), full_spec(scale2), full_spec(bias2)],
            out_specs=row_spec(cout)),
        out_shape=jax.ShapeDtypeStruct((n, cout, length), f32),
        compiler_params=_cparams(y2bytes, y2bytes),
    )(y2, scale2, bias2)
    return out


def _reference(x, w1, g1, b1, w2, g2, b2):
    """Pure-JAX reference mirroring PyTorch semantics (training-mode BatchNorm1d)."""
    def conv(h, w, d):
        return lax.conv_general_dilated(
            h, w, window_strides=(1,), padding=[(d, d)], rhs_dilation=(d,),
            dimension_numbers=('NCH', 'OIH', 'NCH'))

    def bn_lrelu(y, g, b):
        mean = y.mean(axis=(0, 2), keepdims=True)
        var = ((y - mean) ** 2).mean(axis=(0, 2), keepdims=True)
        yh = (y - mean) / jnp.sqrt(var + BN_EPS)
        yh = yh * g.reshape(1, -1, 1) + b.reshape(1, -1, 1)
        return jnp.where(yh >= 0, yh, NEG_SLOPE * yh)

    h = bn_lrelu(conv(x, w1, 1), g1, b1)
    return bn_lrelu(conv(h, w2, 2), g2, b2)


if __name__ == "__main__":
    # DoubleConv(in_channels=4, out_channels=8) -> mid_channels = 4 * 3 = 12, K = 3
    N, C_IN, L = 2, 4, 16
    C_MID, C_OUT, K = 3 * C_IN, 8, 3

    key = jax.random.PRNGKey(0)
    kx, kw1, kw2, kg1, kb1, kg2, kb2 = jax.random.split(key, 7)

    x = jax.random.normal(kx, (N, C_IN, L), jnp.float32)
    # Conv1d weights (bias=False): (out_channels, in_channels, kernel_size)
    w1 = jax.random.normal(kw1, (C_MID, C_IN, K), jnp.float32) * 0.2
    w2 = jax.random.normal(kw2, (C_OUT, C_MID, K), jnp.float32) * 0.2
    # BatchNorm1d affine params
    g1 = 1.0 + 0.1 * jax.random.normal(kg1, (C_MID,), jnp.float32)
    b1 = 0.1 * jax.random.normal(kb1, (C_MID,), jnp.float32)
    g2 = 1.0 + 0.1 * jax.random.normal(kg2, (C_OUT,), jnp.float32)
    b2 = 0.1 * jax.random.normal(kb2, (C_OUT,), jnp.float32)

    out = double_conv(x, w1, g1, b1, w2, g2, b2)
    out = jax.block_until_ready(out)

    ref = _reference(x, w1, g1, b1, w2, g2, b2)
    assert out.shape == (N, C_OUT, L), out.shape
    assert jnp.allclose(out, ref, atol=2e-3, rtol=2e-3), float(jnp.abs(out - ref).max())

    print("KERNEL_OK")
</pallas_src>

<mosaic_0001>
module attributes {stable_mosaic.version = 11 : i64} {
  func.func @_conv_stats_kernel(%arg0: i32, %arg1: memref<1x4x16xf32, #tpu.memory_space<vmem>>, %arg2: memref<12x12xf32, #tpu.memory_space<vmem>>, %arg3: memref<1x12x16xf32, #tpu.memory_space<vmem>>, %arg4: memref<1x12x1xf32, #tpu.memory_space<vmem>>, %arg5: memref<1x12x1xf32, #tpu.memory_space<vmem>>) attributes {dimension_semantics = [#tpu.dimension_semantics<parallel>], iteration_bounds = array<i64: 2>, scalar_prefetch = 0 : i64, scratch_operands = 0 : i64, tpu.core_type = #tpu.core_type<tc>, window_params = [{transform_indices = @transform_0, window_bounds = array<i64: 1, 4, 16>}, {pipeline_mode = #tpu.pipeline_mode<synchronous>, transform_indices = @transform_1, window_bounds = array<i64: 12, 12>}, {transform_indices = @transform_2, window_bounds = array<i64: 1, 12, 16>}, {transform_indices = @transform_3, window_bounds = array<i64: 1, 12, 1>}, {transform_indices = @transform_4, window_bounds = array<i64: 1, 12, 1>}]} {
    %c0 = arith.constant 0 : index
    %c0_0 = arith.constant 0 : index
    %c0_1 = arith.constant 0 : index
    %0 = vector.load %arg1[%c0, %c0_0, %c0_1] : memref<1x4x16xf32, #tpu.memory_space<vmem>>, vector<1x4x16xf32>
    %1 = vector.shape_cast %0 : vector<1x4x16xf32> to vector<4x16xf32>
    %c0_2 = arith.constant 0 : index
    %c0_3 = arith.constant 0 : index
    %2 = vector.load %arg2[%c0_2, %c0_3] : memref<12x12xf32, #tpu.memory_space<vmem>>, vector<12x12xf32>
    %cst = arith.constant 0.000000e+00 : f32
    %3 = vector.broadcast %cst : f32 to vector<4x1xf32>
    %4 = tpu.concatenate %3, %1, %3 in 1 : vector<4x1xf32>, vector<4x16xf32>, vector<4x1xf32> -> vector<4x18xf32>
    %5 = vector.extract_strided_slice %4 {offsets = [0, 0], sizes = [4, 16], strides = [1, 1]} : vector<4x18xf32> to vector<4x16xf32>
    %6 = vector.extract_strided_slice %4 {offsets = [0, 1], sizes = [4, 16], strides = [1, 1]} : vector<4x18xf32> to vector<4x16xf32>
    %7 = vector.extract_strided_slice %4 {offsets = [0, 2], sizes = [4, 16], strides = [1, 1]} : vector<4x18xf32> to vector<4x16xf32>
    %8 = tpu.concatenate %5, %6, %7 in 0 : vector<4x16xf32>, vector<4x16xf32>, vector<4x16xf32> -> vector<12x16xf32>
    %cst_4 = arith.constant dense<0.000000e+00> : vector<12x16xf32>
    %9 = tpu.matmul %2, %8, %cst_4 {dimension_numbers = #tpu.dot_dimension_numbers<[1], [0], [0], [1], [0, 0, 1, 1], [], []>} : vector<12x12xf32>, vector<12x16xf32>, vector<12x16xf32> -> vector<12x16xf32>
    %c0_5 = arith.constant 0 : index
    %c0_6 = arith.constant 0 : index
    %c0_7 = arith.constant 0 : index
    %10 = vector.load %arg3[%c0_5, %c0_6, %c0_7] : memref<1x12x16xf32, #tpu.memory_space<vmem>>, vector<1x12x16xf32>
    %11 = vector.shape_cast %10 : vector<1x12x16xf32> to vector<12x16xf32>
    %12 = vector.shape_cast %9 : vector<12x16xf32> to vector<1x12x16xf32>
    tpu.vector_store %arg3[%c0_5, %c0_6, %c0_7], %12 {strides = array<i32>} : memref<1x12x16xf32, #tpu.memory_space<vmem>>, vector<1x12x16xf32>,
    %cst_8 = arith.constant dense<0.000000e+00> : vector<12xf32>
    %13 = vector.multi_reduction <add>, %9, %cst_8 [1] : vector<12x16xf32> to vector<12xf32>
    %14 = vector.shape_cast %13 : vector<12xf32> to vector<12x1xf32>
    %c0_9 = arith.constant 0 : index
    %c0_10 = arith.constant 0 : index
    %c0_11 = arith.constant 0 : index
    %15 = vector.load %arg4[%c0_9, %c0_10, %c0_11] : memref<1x12x1xf32, #tpu.memory_space<vmem>>, vector<1x12x1xf32>
    %16 = vector.shape_cast %15 : vector<1x12x1xf32> to vector<12x1xf32>
    %17 = vector.shape_cast %14 : vector<12x1xf32> to vector<1x12x1xf32>
    tpu.vector_store %arg4[%c0_9, %c0_10, %c0_11], %17 {strides = array<i32>} : memref<1x12x1xf32, #tpu.memory_space<vmem>>, vector<1x12x1xf32>,
    %18 = arith.mulf %9, %9 : vector<12x16xf32>
    %cst_12 = arith.constant dense<0.000000e+00> : vector<12xf32>
    %19 = vector.multi_reduction <add>, %18, %cst_12 [1] : vector<12x16xf32> to vector<12xf32>
    %20 = vector.shape_cast %19 : vector<12xf32> to vector<12x1xf32>
    %c0_13 = arith.constant 0 : index
    %c0_14 = arith.constant 0 : index
    %c0_15 = arith.constant 0 : index
    %21 = vector.load %arg5[%c0_13, %c0_14, %c0_15] : memref<1x12x1xf32, #tpu.memory_space<vmem>>, vector<1x12x1xf32>
    %22 = vector.shape_cast %21 : vector<1x12x1xf32> to vector<12x1xf32>
    %23 = vector.shape_cast %20 : vector<12x1xf32> to vector<1x12x1xf32>
    tpu.vector_store %arg5[%c0_13, %c0_14, %c0_15], %23 {strides = array<i32>} : memref<1x12x1xf32, #tpu.memory_space<vmem>>, vector<1x12x1xf32>,
    return
  }
  func.func @transform_0(%arg0: i32) -> (i32, i32, i32) {
    %c0_i32 = arith.constant 0 : i32
    %c0_i32_0 = arith.constant 0 : i32
    %c0_i32_1 = arith.constant 0 : i32
    return %arg0, %c0_i32, %c0_i32_0 : i32, i32, i32
  }
  func.func @transform_1(%arg0: i32) -> (i32, i32) {
    %c0_i32 = arith.constant 0 : i32
    %c0_i32_0 = arith.constant 0 : i32
    %c0_i32_1 = arith.constant 0 : i32
    return %c0_i32, %c0_i32_0 : i32, i32
  }
  func.func @transform_2(%arg0: i32) -> (i32, i32, i32) {
    %c0_i32 = arith.constant 0 : i32
    %c0_i32_0 = arith.constant 0 : i32
    %c0_i32_1 = arith.constant 0 : i32
    return %arg0, %c0_i32, %c0_i32_0 : i32, i32, i32
  }
  func.func @transform_3(%arg0: i32) -> (i32, i32, i32) {
    %c0_i32 = arith.constant 0 : i32
    %c0_i32_0 = arith.constant 0 : i32
    %c0_i32_1 = arith.constant 0 : i32
    return %arg0, %c0_i32, %c0_i32_0 : i32, i32, i32
  }
  func.func @transform_4(%arg0: i32) -> (i32, i32, i32) {
    %c0_i32 = arith.constant 0 : i32
    %c0_i32_0 = arith.constant 0 : i32
    %c0_i32_1 = arith.constant 0 : i32
    return %arg0, %c0_i32, %c0_i32_0 : i32, i32, i32
  }
}

</mosaic_0001>

<bundles_post_ra>
// kernel: tpu_custom_call.1
= control target key start
LH: loop header
LB: loop body
LE: loop exit
PB: predicated region body
PF: predicated region fallthrough
CT: control target
= control target key end

     0   :  { %10 = vsyncpa [#allocation3], 0  ;;  %s800_s0 = inlined_call_operand.hbm [shape: f32[2,4,16], index: 0, kind: input, shape index: {}]   ;;  %s801_s1 = inlined_call_operand.hbm [shape: f32[12,12], index: 1, kind: input, shape index: {}]   ;;  %s802_s2 = inlined_call_operand.vmem [shape: f32[2,12,16], index: 2, kind: output, shape index: {0}]   ;;  %s803_s3 = inlined_call_operand.vmem [shape: f32[2,12,1], index: 3, kind: output, shape index: {1}]   ;;  %s804_s4 = inlined_call_operand.vmem [shape: f32[2,12,1], index: 4, kind: output, shape index: {2}]  }
   0x1   :  { %12 = vsyncpa [#allocation3 + $0x1], 0 }
   0x2   :  { %13 = vsyncpa [#allocation5], 0  ;;  %s688_s15 = smov 0   ;;  %s690_s16 = smov 0  }
   0x3   :  { %s692_s17 = smov 0   ;;  %s694_s18 = smov 0  }
   0x4 LB: > { %s160_s21 = sshll.u32 %s801_s1, 4  ;;  %s710_s22 = sadd.s32 4294967295, %s655_s18   ;;  %s655_s18 = sphi %s694_s18, %s811_s18   ;;  %s651_s17 = sphi %s692_s17, %s810_s17   ;;  %s647_s16 = sphi %s690_s16, %s809_s16   ;;  %s643_s15 = sphi %s688_s15, %s808_s15   ;;  %s161_s21 = int_to_ptr.hbm [resolvable:$true] %s160_s21 }
   0x5   : > { %p478_p0 = scmp.ge.s32.totalorder %s655_s18, 1  ;;  %p40_p1 = scmp.eq.s32.totalorder %s710_s22, 0 }
   0x6   : > { %p149_p2 = scmp.lt.s32.totalorder %s655_s18, 3  ;;  %s657_s24 = smov [#allocation4]  }
   0x7   : > { %s162_s25 = sshll.u32 %s657_s24, 4  ;;  %s658_s26 = smov 128   ;;  %s163_s25 = int_to_ptr.vmem [resolvable:$true] %s162_s25 }
   0x8   : > { %p715_p3 = pnand %p478_p0, %p149_p2  ;;  %s659_s27 = smov 8  }
   0x9   : > { %s724_s28 = sadd.s32 1, %s655_s18   ;;  %s26_s30 = sadd.s32 1, %s651_s17 }
   0xa   : > { %p508_p4 = pneg %p715_p3  ;;  %s23_s29 = ssub.s32 %s655_s18, %s724_s28 }
   0xb   : > { %p24_p6 = scmp.eq.s32.totalorder %s23_s29, 0  ;;  %p33_p7 = scmp.ne.s32.totalorder %s651_s17, %s647_s16 }
   0xc   : > { %p509_p5 = pnand %p508_p4, %p40_p1  ;;  %p34_p8 = scmp.eq.s32.totalorder %s655_s18, 0 }
   0xd   : > { %p39_p9 = scmp.ne.s32.totalorder %s647_s16, %s643_s15  ;;  %p517_p12 = scmp.lt.s32.totalorder %s655_s18, 2 }
   0xe   : > { %511 = dma.hbm_to_vmem [thread:$0]  (!%p509_p5), %s161_s21, 256, %s163_s25, [#allocation5], %s658_s26, %s658_s26, %s659_s27  }
   0xf   : > { %s734_s5 = scalar_select %p24_p6, %s651_s17, %s26_s30  }
  0x10   : > { %p35_p10 = por %p34_p8, %p33_p7  ;;  %p738_p11 = por %p40_p1, %p39_p9 }
  0x11   : > { %s176_s7 = sand.u32 1, %s651_s17   ;;  %s482_s9 = sshll.u32 %s655_s18, 2 }
  0x12   : > { %s481_s8 = sshll.u32 %s176_s7, 2  ;;  %s184_s12 = scalar_lea.hbm %s800_s0, %s482_s9 }
  0x13   : > { %s180_s13 = scalar_lea.vmem [#allocation2], %s481_s8  ;;  %s186_s19 = sshll.u32 %s184_s12, 4  ;;  %s187_s19 = int_to_ptr.hbm [resolvable:$true] %s186_s19 }
  0x14   : > { %s188_s14 = sshll.u32 %s180_s13, 4  ;;  %p748_p13 = pnand %p517_p12, %p35_p10  ;;  %s189_s14 = int_to_ptr.vmem [resolvable:$true] %s188_s14 }
  0x15   : > { %s177_s20 = scalar_lea.sflag [#allocation3], %s176_s7  ;;  %s587_s21 = sshra.s32 %s187_s19, 4  ;;  %s588_s21 = int_to_ptr.hbm [resolvable:$true] %s587_s21 }
  0x16   : > { %s589_s24 = scalar_lea.hbm %s588_s21, 4  ;;  %p591_p2 = pneg %p748_p13 }
  0x17   : > { %p590_p0 = scmp.ne.s32.totalorder %s588_s21, %s589_s24  ;;  %s594_s26 = scalar_lea.hbm %s800_s0, 8 }
  0x18   : > { %p595_p6 = scmp.lt.s32.totalorder %s588_s21, %s800_s0  ;;  %p596_p7 = scmp.lt.s32.totalorder %s594_s26, %s589_s24 }
  0x19   : > { %p592_p4 = pnand %p591_p2, %p590_p0 }
  0x1a   : > { %p597_p8 = por %p596_p7, %p595_p6 }
  0x1b   : > { %p593_p5 = pneg %p592_p4 }
  0x1d   : > { %p598_p9 = pnand %p597_p8, %p593_p5 }
  0x1f   : > { %601 = shalt.err (!%p598_p9)
}
  0x20   : > { %515 = dma.hbm_to_vmem [thread:$0]  (!%p748_p13), %s187_s19, 64, %s189_s14, %s177_s20  }
  0x21   : > { %197 = sbr.rel (%p715_p3) target bundleno = 530 (0x212), region = 28  ;;  %s199_s30 = sand.u32 (!%p715_p3), 1, %s647_s16  }
  0x22   : > { %s484_s7 = sshll.u32 (!%p715_p3), %s199_s30, 2  ;;  %s200_s8 = scalar_lea.sflag (!%p715_p3), [#allocation3], %s199_s30 }
  0x23   : > { %s203_s9 = scalar_lea.vmem (!%p715_p3), [#allocation2], %s484_s7 }
  0x26   : > { %634 = dma.done.wait (%p738_p11), %s200_s8, 64  }
  0x27   : > { %636 = vsyncadd (%p738_p11), %s200_s8, 4294967232 }
  0x28   : > { %638 = dma.done.wait (%p40_p1), [#allocation5], 256  }
  0x29   : > { %640 = vsyncadd (%p40_p1), [#allocation5], 4294967040  ;;  %v259_v0 = vld [vmem:[%s203_s9] sm:$0xf]  ;;  %s660_s23 = smov 1   ;;  %vm266_vm0 = vcmask 7168  }
  0x2a   : > { %263 = vrot.lane.b32.xlu0 %v259_v0, %s660_s23  ;;  %vm268_vm1 = vcmask 138240   ;;  %s661_s10 = smov 126   ;;  %s662_s6 = smov 127   ;;  %vm277_vm2 = vcmask 1043456   ;;  %v261_v7 = vld [vmem:[#allocation4 + $0x8] sm:$0xf] }
  0x2b   : > { %vm279_vm3 = vcmask 97280   ;;  %v260_v8 = vld [vmem:[#allocation4] sm:$0xff]  ;;  %p244_p1 = scmp.lt.s32.totalorder %s710_s22, 1  ;;  %vm313_vm4 = vcmask 125952   ;;  %vm311_vm5 = vcmask 130048   ;;  %vm322_vm6 = vcmask 3072  }
  0x2d   : > { %s813_s22 = smov (!%p244_p1, %s710_s22), 1 }
  0x2e   : > { %s497_s11 = sshll.u32 %s813_s22, 4 }
  0x2f   : > { %s248_s14 = scalar_lea.vmem %s802_s2, %s497_s11  ;;  %s253_s15 = scalar_lea.vmem %s803_s3, %s497_s11 }
  0x30   : > { %s258_s24 = scalar_lea.vmem %s804_s4, %s497_s11 }
  0x9c   : > { %v264_v1 = vpop.permute.xlu0 %263 }
  0x9d   : > { %v267_v2 = vsel %vm266_vm0, 0.0, %v264_v1 }
  0x9e   : > { %v269_v3 = vsel %vm268_vm1, %v267_v2, 0.0 }
  0x9f   : > { %275 = vrot.lane.b32.xlu0 %v269_v3, %s661_s10  ;;  %v271_v4 = vrot.slane %v269_v3, 4 }
  0xa1   : > { %272 = vrot.lane.b32.xlu1 %v271_v4, %s662_s6 }
 0x111   : > { %v276_v5 = vpop.permute.xlu0 %275 }
 0x112   : > { %492 = vmatpush.msk.msra.mxu0 %vm277_vm2, %v276_v5  ;;  %500 = vmatpush.msk.msra.mxu1 %vm277_vm2, %v276_v5 }
 0x113   : > { %v273_v6 = vpop.permute.xlu1 %272 }
 0x114   : > { %v278_v9 = vsel %vm277_vm2, %v269_v3, %v273_v6 }
 0x115   : > { %303 = vmatpush.msra.mxu0 %v278_v9  ;;  %501 = vmatpush.msra.mxu1 %v278_v9 }
 0x116   : > { %494 = vmatmul.msk.f32.vlgmr.msra.gmra.mxu1 %vm279_vm3, %v261_v7  ;;  %493 = vmatmul.msk.f32.vlgmr.msra.gmra.mxu0 %vm279_vm3, %v260_v8 }
 0x193   : > { %v308_v10 = vpop.f32.mrf.mxu1  ;;  %v305_v11 = vpop.f32.mrf.mxu0 }
 0x194   : > { %v325_v12 = vmul.f32 %v308_v10, %v308_v10  ;;  %v318_v13 = vsel %vm313_vm4, %v308_v10, 0.0  ;;  %314 = vst.msk [vmem:[%s248_s14 + $0x8] sm:$0xf] %vm313_vm4, %v308_v10  ;;  %v315_v14 = vsel %vm311_vm5, %v305_v11, 0.0  ;;  %v324_v16 = vmul.f32 %v305_v11, %v305_v11 }
 0x195   : > { %319 = vadd.xlane.f32.xlu2 %v318_v13  ;;  %316 = vadd.xlane.f32.xlu1 %v315_v14  ;;  %312 = vst.msk [vmem:[%s248_s14] sm:$0xff] %vm311_vm5, %v305_v11 }
 0x196   : > { %v329_v15 = vsel %vm313_vm4, %v325_v12, 0.0  ;;  %v326_v17 = vsel %vm311_vm5, %v324_v16, 0.0 }
 0x197   : > { %330 = vadd.xlane.f32.xlu0 %v329_v15 }
 0x19d   : > { %327 = vadd.xlane.f32.xlu2 %v326_v17 }
 0x208   : > { %v320_v18 = vpop.xlane.xlu2 %319  ;;  %v317_v19 = vpop.xlane.xlu1 %316 }
 0x209   : > { %323 = vst.msk [vmem:[%s253_s15 + $0x8] sm:$0xf] %vm322_vm6, %v320_v18 }
 0x20a   : > { %v331_v20 = vpop.xlane.xlu0 %330  ;;  %321 = vst.msk [vmem:[%s253_s15] sm:$0xff] %vm266_vm0, %v317_v19 }
 0x20b   : > { %333 = vst.msk [vmem:[%s258_s24 + $0x8] sm:$0xf] %vm322_vm6, %v331_v20 }
 0x210   : > { %v328_v21 = vpop.xlane.xlu2 %327 }
 0x211   : > { %332 = vst.msk [vmem:[%s258_s24] sm:$0xff] %vm266_vm0, %v328_v21 }
 0x212 PF: > { %p16_p3 = scmp.ge.s32.totalorder %s724_s28, 4   ;;  %s808_s15 = smov %s647_s16 }
 0x213   : > { %s809_s16 = smov %s651_s17  ;;  %s810_s17 = smov %s734_s5 }
 0x214   : > { %s811_s18 = smov %s724_s28  ;;  %18 = sbr.rel (!%p16_p3) target bundleno = 4 (0x4), region = 96 }
 0x219   :  { %387 = vsyncpa [#allocation3], 1 }
 0x21a   :  { %389 = vsyncpa [#allocation3 + $0x1], 1 }
 0x21b   :  { %390 = vsyncpa [#allocation5], 1 }

</bundles_post_ra>
